<compile_context>
chip_gen: v5e
topology: v5e:2x2
jax: 0.10.0
libtpu: 0.0.40
codegen_flags: <defaults>
</compile_context>

<pallas_src>
import functools

import jax
import jax.numpy as jnp
from jax.experimental import pallas as pl
from jax.experimental.pallas import tpu as pltpu

WEIGHT_PP = 0.5   # cfg['train']['weight_pp']  (synthetic, deterministic)
WEIGHT_HR = 0.1   # cfg['train']['weight_hr']  (synthetic, deterministic)


def _loss_kernel(logits_ref, labels_ref, peak_ref, plab_ref, hr_ref,
                 out_ref, acc_ref, *, n_rows, n_cols, hard_peak_labels):
    i = pl.program_id(0)                      # row-tile index (shared batch axis)
    j = pl.program_id(1)                      # col-tile index (peak/BCE only)
    ni = pl.num_programs(0)
    nj = pl.num_programs(1)

    block_rows, block_cols = peak_ref.shape

    @pl.when(jnp.logical_and(i == 0, j == 0))
    def _init():
        acc_ref[0] = jnp.float32(0.0)         # BCE sum
        acc_ref[1] = jnp.float32(0.0)         # CE  sum
        acc_ref[2] = jnp.float32(0.0)         # L1  sum

    # Row-validity mask for this tile (handles a ragged final row tile; the
    # out-of-bounds part of the block is undefined data, masked out by select).
    row_ids = (jax.lax.broadcasted_iota(jnp.int32, (block_rows, 1), 0)
               + i * block_rows)
    row_mask = row_ids < n_rows

    # ---- binary_cross_entropy partial over this (block_rows, block_cols) ----
    col_ids = (jax.lax.broadcasted_iota(jnp.int32, (1, block_cols), 1)
               + j * block_cols)
    mask = jnp.logical_and(row_mask, col_ids < n_cols)
    p = peak_ref[...].astype(jnp.float32)
    y = plab_ref[...].astype(jnp.float32)
    if hard_peak_labels:
        # y is known to be in {0, 1}: one log per element instead of two.
        term = -jnp.maximum(jnp.log(jnp.where(y > 0.5, p, 1.0 - p)), -100.0)
    else:
        # General (soft-target) form; matches F.binary_cross_entropy incl. the
        # -100 log clamp. Clamp BEFORE the multiply so 0 * (-inf) never occurs.
        log_p = jnp.maximum(jnp.log(p), -100.0)
        log_1mp = jnp.maximum(jnp.log(1.0 - p), -100.0)
        term = -(log_1mp + y * (log_p - log_1mp))
    acc_ref[0] += jnp.sum(jnp.where(mask, term, 0.0))

    # ---- CrossEntropy + L1 partials, once per row tile (block is resident
    #      across the column axis: its block index does not change with j). ---
    @pl.when(j == 0)
    def _per_row_tile():
        logits = logits_ref[...].astype(jnp.float32)            # (rows, C)
        c = logits.shape[-1]
        m = jnp.max(logits, axis=-1, keepdims=True)
        shifted = logits - m
        lse = jnp.log(jnp.sum(jnp.exp(shifted), axis=-1, keepdims=True))
        labels = labels_ref[...]                                 # (rows, 1) int32
        cls_iota = jax.lax.broadcasted_iota(jnp.int32, (block_rows, c), 1)
        # CE_i = lse_i - shifted[i, label_i]. NOTE: out-of-range labels silently
        # contribute only lse (PyTorch would raise) -- documented behavior.
        picked = jnp.sum(jnp.where(cls_iota == labels, shifted, 0.0),
                         axis=-1, keepdims=True)
        ce_rows = lse - picked
        acc_ref[1] += jnp.sum(jnp.where(row_mask, ce_rows, 0.0))

        hr = hr_ref[...].astype(jnp.float32)                     # (rows, 2)
        l1_rows = jnp.abs(hr[:, 0:1] - hr[:, 1:2])
        acc_ref[2] += jnp.sum(jnp.where(row_mask, l1_rows, 0.0))

    @pl.when(jnp.logical_and(i == ni - 1, j == nj - 1))
    def _finalize():
        pp_loss = acc_ref[0] / jnp.float32(n_rows * n_cols)
        cl_loss = acc_ref[1] / jnp.float32(n_rows)
        hr_loss = acc_ref[2] / jnp.float32(n_rows)
        out_ref[0] = cl_loss + WEIGHT_PP * pp_loss + WEIGHT_HR * hr_loss


def p_hr_c_loss(classify_result, classify_labels, peak_result, peak_labels,
                hr_result, hr_gt, *, hard_peak_labels=False,
                tile_byte_budget=4 * 1024 * 1024,
                max_block_rows=None, max_block_cols=None):
    """Pallas implementation of P_HR_C_loss.forward.

    classify_result: (N, C) float logits (native dtype; cast in-kernel)
    classify_labels: (N,)   int class indices
    peak_result    : (N, L) float probabilities in (0, 1)
    peak_labels    : (N, L) float targets in [0, 1]
    hr_result      : (N,)   float
    hr_gt          : (N,)   float
    returns scalar float32 loss.
    """
    n, c = classify_result.shape
    n_p, l = peak_result.shape
    if peak_labels.shape != (n_p, l):
        raise ValueError("peak_result / peak_labels shape mismatch")
    classify_labels = jnp.reshape(classify_labels, (-1,))
    hr_result = jnp.reshape(hr_result, (-1,))
    hr_gt = jnp.reshape(hr_gt, (-1,))
    if not (n_p == n and classify_labels.shape[0] == n
            and hr_result.shape[0] == n and hr_gt.shape[0] == n):
        raise ValueError("all inputs must share the same batch dimension")

    labels_2d = classify_labels.reshape(n, 1).astype(jnp.int32)
    hr_pack = jnp.stack([hr_result, hr_gt], axis=1)              # (N, 2), tiny

    peak_bytes = jnp.dtype(peak_result.dtype).itemsize
    plab_bytes = jnp.dtype(peak_labels.dtype).itemsize
    logit_bytes = jnp.dtype(classify_result.dtype).itemsize
    hr_bytes = jnp.dtype(hr_pack.dtype).itemsize

    # ---- column tiling of the dominant (N, L) BCE stream ---------------------
    # Pick the widest column block such that at least 8 rows of both peak
    # streams fit in the byte budget (full L when possible -> lane-dense).
    col_cap = max(1, tile_byte_budget // (8 * (peak_bytes + plab_bytes)))
    if max_block_cols is not None:
        col_cap = min(col_cap, max_block_cols)
    if col_cap >= l:
        block_cols = l                                  # full dim -> always legal
    else:
        block_cols = min(max(128, (col_cap // 128) * 128), l)

    # ---- row tiling shared by all streams (same batch axis) ------------------
    bytes_per_row = (block_cols * (peak_bytes + plab_bytes)
                     + c * logit_bytes + 4 + 2 * hr_bytes)
    row_cap = max(8, tile_byte_budget // bytes_per_row)
    if max_block_rows is not None:
        row_cap = min(row_cap, max(8, max_block_rows))
    if row_cap >= n:
        block_rows = n                                  # full dim -> always legal
    else:
        block_rows = max(8, (row_cap // 8) * 8)

    num_row_tiles = pl.cdiv(n, block_rows)
    num_col_tiles = pl.cdiv(l, block_cols)

    # VMEM limit derived from the actual double-buffered block footprint, with
    # headroom for elementwise f32 temporaries; clamped so it is safe on v7x
    # (64 MiB physical) yet raised above the 16 MiB v5e default.
    tile_bytes = block_rows * bytes_per_row
    vmem_limit = int(min(max(32 << 20, 8 * tile_bytes), 48 << 20))

    kernel = functools.partial(_loss_kernel, n_rows=n, n_cols=l,
                               hard_peak_labels=hard_peak_labels)

    out = pl.pallas_call(
        kernel,
        out_shape=jax.ShapeDtypeStruct((1,), jnp.float32),
        grid=(num_row_tiles, num_col_tiles),
        in_specs=[
            pl.BlockSpec((block_rows, c), lambda i, j: (i, 0)),            # logits
            pl.BlockSpec((block_rows, 1), lambda i, j: (i, 0)),            # labels
            pl.BlockSpec((block_rows, block_cols), lambda i, j: (i, j)),   # peak_result
            pl.BlockSpec((block_rows, block_cols), lambda i, j: (i, j)),   # peak_labels
            pl.BlockSpec((block_rows, 2), lambda i, j: (i, 0)),            # hr packed
        ],
        out_specs=pl.BlockSpec(memory_space=pltpu.MemorySpace.SMEM),
        scratch_shapes=[pltpu.SMEM((3,), jnp.float32)],
        compiler_params=pltpu.CompilerParams(
            dimension_semantics=("arbitrary", "arbitrary"),
            vmem_limit_bytes=vmem_limit),
    )(classify_result, labels_2d, peak_result, peak_labels, hr_pack)
    return out[0]


def _reference(classify_result, classify_labels, peak_result, peak_labels,
               hr_result, hr_gt):
    # Pure-JAX reference for a sanity check.
    logits = classify_result.astype(jnp.float32)
    log_probs = jax.nn.log_softmax(logits, axis=-1)
    n = logits.shape[0]
    cl = -jnp.mean(log_probs[jnp.arange(n), classify_labels])
    p = peak_result.astype(jnp.float32)
    y = peak_labels.astype(jnp.float32)
    log_p = jnp.maximum(jnp.log(p), -100.0)
    log_1mp = jnp.maximum(jnp.log(1.0 - p), -100.0)
    pp = jnp.mean(-(y * log_p + (1.0 - y) * log_1mp))
    hr = jnp.mean(jnp.abs(hr_result.astype(jnp.float32)
                          - hr_gt.astype(jnp.float32)))
    return cl + WEIGHT_PP * pp + WEIGHT_HR * hr


def _make_inputs(key, n, c, l):
    k1, k2, k3, k4, k5, k6 = jax.random.split(key, 6)
    classify_result = jax.random.normal(k1, (n, c), dtype=jnp.float32)
    classify_labels = jax.random.randint(k2, (n,), 0, c, dtype=jnp.int32)
    peak_result = jax.nn.sigmoid(jax.random.normal(k3, (n, l), dtype=jnp.float32))
    peak_labels = (jax.random.uniform(k4, (n, l)) > 0.5).astype(jnp.float32)
    hr_result = 60.0 + 40.0 * jax.random.uniform(k5, (n,), dtype=jnp.float32)
    hr_gt = 60.0 + 40.0 * jax.random.uniform(k6, (n,), dtype=jnp.float32)
    return (classify_result, classify_labels, peak_result, peak_labels,
            hr_result, hr_gt)


if __name__ == "__main__":
    key = jax.random.PRNGKey(0)

    # --- test 1: single-tile path (N=8, C=4, L=128), default byte-budget tiling
    args = _make_inputs(key, 8, 4, 128)
    loss = jax.block_until_ready(p_hr_c_loss(*args))
    ref = _reference(*args)
    assert jnp.allclose(loss, ref, rtol=1e-4, atol=1e-5), (loss, ref)

    # --- test 2: ragged multi-tile path on BOTH grid axes, no wrapper padding:
    #     N=20 (last row tile masked), L=320 (last col tile masked),
    #     grid = (3 row tiles, 3 col tiles), logits/labels/hr resident across j.
    args2 = _make_inputs(jax.random.PRNGKey(1), 20, 4, 320)
    loss2 = jax.block_until_ready(
        p_hr_c_loss(*args2, max_block_rows=8, max_block_cols=128))
    ref2 = _reference(*args2)
    assert jnp.allclose(loss2, ref2, rtol=1e-4, atol=1e-5), (loss2, ref2)

    # --- test 3: hard-label single-log BCE fast path ---------------------------
    loss3 = jax.block_until_ready(p_hr_c_loss(*args, hard_peak_labels=True))
    assert jnp.allclose(loss3, ref, rtol=1e-4, atol=1e-5), (loss3, ref)

    print("KERNEL_OK")
</pallas_src>

<mosaic_0001>
module attributes {stable_mosaic.version = 11 : i64} {
  func.func @_loss_kernel(%arg0: i32, %arg1: i32, %arg2: memref<8x4xf32, #tpu.memory_space<vmem>>, %arg3: memref<8x1xi32, #tpu.memory_space<vmem>>, %arg4: memref<8x128xf32, #tpu.memory_space<vmem>>, %arg5: memref<8x128xf32, #tpu.memory_space<vmem>>, %arg6: memref<8x2xf32, #tpu.memory_space<vmem>>, %arg7: memref<1xf32, #tpu.memory_space<smem>>, %arg8: memref<3xf32, #tpu.memory_space<smem>>) attributes {dimension_semantics = [#tpu.dimension_semantics<arbitrary>, #tpu.dimension_semantics<arbitrary>], iteration_bounds = array<i64: 1, 1>, scalar_prefetch = 0 : i64, scratch_operands = 1 : i64, tpu.core_type = #tpu.core_type<tc>, window_params = [{transform_indices = @transform_0, window_bounds = array<i64: 8, 4>}, {transform_indices = @transform_1, window_bounds = array<i64: 8, 1>}, {transform_indices = @transform_2, window_bounds = array<i64: 8, 128>}, {transform_indices = @transform_3, window_bounds = array<i64: 8, 128>}, {transform_indices = @transform_4, window_bounds = array<i64: 8, 2>}, {transform_indices = @transform_5, window_bounds = array<i64: 1>}]} {
    %c0_i32 = arith.constant 0 : i32
    %0 = arith.cmpi eq, %arg0, %c0_i32 : i32
    %c0_i32_0 = arith.constant 0 : i32
    %1 = arith.cmpi eq, %arg1, %c0_i32_0 : i32
    %2 = arith.andi %0, %1 : i1
    %3 = arith.extui %2 : i1 to i32
    %c0_i32_1 = arith.constant 0 : i32
    %4 = arith.cmpi ne, %3, %c0_i32_1 : i32
    scf.if %4 {
      %cst_19 = arith.constant 0.000000e+00 : f32
      %c0_20 = arith.constant 0 : index
      %52 = memref.load %arg8[%c0_20] : memref<3xf32, #tpu.memory_space<smem>>
      memref.store %cst_19, %arg8[%c0_20] : memref<3xf32, #tpu.memory_space<smem>>
      %cst_21 = arith.constant 0.000000e+00 : f32
      %c1 = arith.constant 1 : index
      %53 = memref.load %arg8[%c1] : memref<3xf32, #tpu.memory_space<smem>>
      memref.store %cst_21, %arg8[%c1] : memref<3xf32, #tpu.memory_space<smem>>
      %cst_22 = arith.constant 0.000000e+00 : f32
      %c2 = arith.constant 2 : index
      %54 = memref.load %arg8[%c2] : memref<3xf32, #tpu.memory_space<smem>>
      memref.store %cst_22, %arg8[%c2] : memref<3xf32, #tpu.memory_space<smem>>
    } else {
    }
    %5 = tpu.iota {dimensions = array<i32: 0>} : vector<8x1xi32>
    %c8_i32 = arith.constant 8 : i32
    %6 = arith.muli %arg0, %c8_i32 : i32
    %7 = vector.broadcast %6 : i32 to vector<8x1xi32>
    %8 = arith.addi %5, %7 : vector<8x1xi32>
    %c8_i32_2 = arith.constant 8 : i32
    %9 = vector.broadcast %c8_i32_2 : i32 to vector<8x1xi32>
    %10 = arith.cmpi slt, %8, %9 : vector<8x1xi32>
    %11 = tpu.iota {dimensions = array<i32: 1>} : vector<1x128xi32>
    %c128_i32 = arith.constant 128 : i32
    %12 = arith.muli %arg1, %c128_i32 : i32
    %13 = vector.broadcast %12 : i32 to vector<1x128xi32>
    %14 = arith.addi %11, %13 : vector<1x128xi32>
    %c128_i32_3 = arith.constant 128 : i32
    %15 = vector.broadcast %c128_i32_3 : i32 to vector<1x128xi32>
    %16 = arith.cmpi slt, %14, %15 : vector<1x128xi32>
    %17 = vector.broadcast %10 : vector<8x1xi1> to vector<8x128xi1>
    %18 = vector.broadcast %16 : vector<1x128xi1> to vector<8x128xi1>
    %19 = arith.andi %17, %18 : vector<8x128xi1>
    %c0 = arith.constant 0 : index
    %c0_4 = arith.constant 0 : index
    %20 = vector.load %arg4[%c0, %c0_4] : memref<8x128xf32, #tpu.memory_space<vmem>>, vector<8x128xf32>
    %c0_5 = arith.constant 0 : index
    %c0_6 = arith.constant 0 : index
    %21 = vector.load %arg5[%c0_5, %c0_6] : memref<8x128xf32, #tpu.memory_space<vmem>>, vector<8x128xf32>
    %22 = math.log %20 : vector<8x128xf32>
    %cst = arith.constant -1.000000e+02 : f32
    %23 = vector.broadcast %cst : f32 to vector<8x128xf32>
    %24 = arith.maximumf %22, %23 : vector<8x128xf32>
    %cst_7 = arith.constant 1.000000e+00 : f32
    %25 = vector.broadcast %cst_7 : f32 to vector<8x128xf32>
    %26 = arith.subf %25, %20 : vector<8x128xf32>
    %27 = math.log %26 : vector<8x128xf32>
    %cst_8 = arith.constant -1.000000e+02 : f32
    %28 = vector.broadcast %cst_8 : f32 to vector<8x128xf32>
    %29 = arith.maximumf %27, %28 : vector<8x128xf32>
    %30 = arith.subf %24, %29 : vector<8x128xf32>
    %31 = arith.mulf %21, %30 : vector<8x128xf32>
    %32 = arith.addf %29, %31 : vector<8x128xf32>
    %cst_9 = arith.constant 0.000000e+00 : f32
    %33 = vector.broadcast %cst_9 : f32 to vector<8x128xf32>
    %34 = arith.subf %33, %32 : vector<8x128xf32>
    %c0_10 = arith.constant 0 : index
    %35 = memref.load %arg8[%c0_10] : memref<3xf32, #tpu.memory_space<smem>>
    %cst_11 = arith.constant 0.000000e+00 : f32
    %36 = vector.broadcast %cst_11 : f32 to vector<8x128xf32>
    %37 = arith.select %19, %34, %36 : vector<8x128xi1>, vector<8x128xf32>
    %38 = vector.shape_cast %37 : vector<8x128xf32> to vector<1x8x128xf32>
    %cst_12 = arith.constant dense<0.000000e+00> : vector<1xf32>
    %39 = vector.multi_reduction <add>, %38, %cst_12 [1, 2] : vector<1x8x128xf32> to vector<1xf32>
    %40 = vector.shape_cast %39 : vector<1xf32> to vector<1x1x1xf32>
    %41 = vector.extract %40[0, 0, 0] : f32 from vector<1x1x1xf32>
    %42 = arith.addf %35, %41 : f32
    %c0_13 = arith.constant 0 : index
    %43 = memref.load %arg8[%c0_13] : memref<3xf32, #tpu.memory_space<smem>>
    memref.store %42, %arg8[%c0_13] : memref<3xf32, #tpu.memory_space<smem>>
    %c0_i32_14 = arith.constant 0 : i32
    %44 = arith.cmpi eq, %arg1, %c0_i32_14 : i32
    %45 = arith.extui %44 : i1 to i32
    %c0_i32_15 = arith.constant 0 : i32
    %46 = arith.cmpi ne, %45, %c0_i32_15 : i32
    scf.if %46 {
      %c0_19 = arith.constant 0 : index
      %c0_20 = arith.constant 0 : index
      %52 = vector.load %arg2[%c0_19, %c0_20] : memref<8x4xf32, #tpu.memory_space<vmem>>, vector<8x4xf32>
      %cst_21 = arith.constant dense<0xFF800000> : vector<8xf32>
      %53 = vector.multi_reduction <maximumf>, %52, %cst_21 [1] : vector<8x4xf32> to vector<8xf32>
      %54 = vector.shape_cast %53 : vector<8xf32> to vector<8x1xf32>
      %55 = vector.broadcast %54 : vector<8x1xf32> to vector<8x4xf32>
      %56 = arith.subf %52, %55 : vector<8x4xf32>
      %57 = math.exp %56 : vector<8x4xf32>
      %cst_22 = arith.constant dense<0.000000e+00> : vector<8xf32>
      %58 = vector.multi_reduction <add>, %57, %cst_22 [1] : vector<8x4xf32> to vector<8xf32>
      %59 = vector.shape_cast %58 : vector<8xf32> to vector<8x1xf32>
      %60 = math.log %59 : vector<8x1xf32>
      %c0_23 = arith.constant 0 : index
      %c0_24 = arith.constant 0 : index
      %61 = vector.load %arg3[%c0_23, %c0_24] : memref<8x1xi32, #tpu.memory_space<vmem>>, vector<8x1xi32>
      %62 = tpu.iota {dimensions = array<i32: 1>} : vector<8x4xi32>
      %63 = vector.broadcast %61 : vector<8x1xi32> to vector<8x4xi32>
      %64 = arith.cmpi eq, %62, %63 : vector<8x4xi32>
      %cst_25 = arith.constant 0.000000e+00 : f32
      %65 = vector.broadcast %cst_25 : f32 to vector<8x4xf32>
      %66 = arith.select %64, %56, %65 : vector<8x4xi1>, vector<8x4xf32>
      %cst_26 = arith.constant dense<0.000000e+00> : vector<8xf32>
      %67 = vector.multi_reduction <add>, %66, %cst_26 [1] : vector<8x4xf32> to vector<8xf32>
      %68 = vector.shape_cast %67 : vector<8xf32> to vector<8x1xf32>
      %69 = arith.subf %60, %68 : vector<8x1xf32>
      %c1 = arith.constant 1 : index
      %70 = memref.load %arg8[%c1] : memref<3xf32, #tpu.memory_space<smem>>
      %cst_27 = arith.constant 0.000000e+00 : f32
      %71 = vector.broadcast %cst_27 : f32 to vector<8x1xf32>
      %72 = arith.select %10, %69, %71 : vector<8x1xi1>, vector<8x1xf32>
      %73 = vector.shape_cast %72 : vector<8x1xf32> to vector<1x8x1xf32>
      %cst_28 = arith.constant dense<0.000000e+00> : vector<1xf32>
      %74 = vector.multi_reduction <add>, %73, %cst_28 [1, 2] : vector<1x8x1xf32> to vector<1xf32>
      %75 = vector.shape_cast %74 : vector<1xf32> to vector<1x1x1xf32>
      %76 = vector.extract %75[0, 0, 0] : f32 from vector<1x1x1xf32>
      %77 = arith.addf %70, %76 : f32
      %c1_29 = arith.constant 1 : index
      %78 = memref.load %arg8[%c1_29] : memref<3xf32, #tpu.memory_space<smem>>
      memref.store %77, %arg8[%c1_29] : memref<3xf32, #tpu.memory_space<smem>>
      %c0_30 = arith.constant 0 : index
      %c0_31 = arith.constant 0 : index
      %79 = vector.load %arg6[%c0_30, %c0_31] : memref<8x2xf32, #tpu.memory_space<vmem>>, vector<8x2xf32>
      %80 = vector.extract_strided_slice %79 {offsets = [0, 0], sizes = [8, 1], strides = [1, 1]} : vector<8x2xf32> to vector<8x1xf32>
      %81 = vector.extract_strided_slice %79 {offsets = [0, 1], sizes = [8, 1], strides = [1, 1]} : vector<8x2xf32> to vector<8x1xf32>
      %82 = arith.subf %80, %81 : vector<8x1xf32>
      %83 = math.absf %82 : vector<8x1xf32>
      %c2 = arith.constant 2 : index
      %84 = memref.load %arg8[%c2] : memref<3xf32, #tpu.memory_space<smem>>
      %cst_32 = arith.constant 0.000000e+00 : f32
      %85 = vector.broadcast %cst_32 : f32 to vector<8x1xf32>
      %86 = arith.select %10, %83, %85 : vector<8x1xi1>, vector<8x1xf32>
      %87 = vector.shape_cast %86 : vector<8x1xf32> to vector<1x8x1xf32>
      %cst_33 = arith.constant dense<0.000000e+00> : vector<1xf32>
      %88 = vector.multi_reduction <add>, %87, %cst_33 [1, 2] : vector<1x8x1xf32> to vector<1xf32>
      %89 = vector.shape_cast %88 : vector<1xf32> to vector<1x1x1xf32>
      %90 = vector.extract %89[0, 0, 0] : f32 from vector<1x1x1xf32>
      %91 = arith.addf %84, %90 : f32
      %c2_34 = arith.constant 2 : index
      %92 = memref.load %arg8[%c2_34] : memref<3xf32, #tpu.memory_space<smem>>
      memref.store %91, %arg8[%c2_34] : memref<3xf32, #tpu.memory_space<smem>>
    } else {
    }
    %c0_i32_16 = arith.constant 0 : i32
    %47 = arith.cmpi eq, %arg0, %c0_i32_16 : i32
    %c0_i32_17 = arith.constant 0 : i32
    %48 = arith.cmpi eq, %arg1, %c0_i32_17 : i32
    %49 = arith.andi %47, %48 : i1
    %50 = arith.extui %49 : i1 to i32
    %c0_i32_18 = arith.constant 0 : i32
    %51 = arith.cmpi ne, %50, %c0_i32_18 : i32
    scf.if %51 {
      %c0_19 = arith.constant 0 : index
      %52 = memref.load %arg8[%c0_19] : memref<3xf32, #tpu.memory_space<smem>>
      %cst_20 = arith.constant 1.024000e+03 : f32
      %53 = arith.divf %52, %cst_20 : f32
      %c1 = arith.constant 1 : index
      %54 = memref.load %arg8[%c1] : memref<3xf32, #tpu.memory_space<smem>>
      %cst_21 = arith.constant 8.000000e+00 : f32
      %55 = arith.divf %54, %cst_21 : f32
      %c2 = arith.constant 2 : index
      %56 = memref.load %arg8[%c2] : memref<3xf32, #tpu.memory_space<smem>>
      %cst_22 = arith.constant 8.000000e+00 : f32
      %57 = arith.divf %56, %cst_22 : f32
      %cst_23 = arith.constant 5.000000e-01 : f32
      %58 = arith.mulf %cst_23, %53 : f32
      %59 = arith.addf %55, %58 : f32
      %cst_24 = arith.constant 1.000000e-01 : f32
      %60 = arith.mulf %cst_24, %57 : f32
      %61 = arith.addf %59, %60 : f32
      %c0_25 = arith.constant 0 : index
      %62 = memref.load %arg7[%c0_25] : memref<1xf32, #tpu.memory_space<smem>>
      memref.store %61, %arg7[%c0_25] : memref<1xf32, #tpu.memory_space<smem>>
    } else {
    }
    return
  }
  func.func @transform_0(%arg0: i32, %arg1: i32) -> (i32, i32) {
    %c0_i32 = arith.constant 0 : i32
    %c0_i32_0 = arith.constant 0 : i32
    return %arg0, %c0_i32 : i32, i32
  }
  func.func @transform_1(%arg0: i32, %arg1: i32) -> (i32, i32) {
    %c0_i32 = arith.constant 0 : i32
    %c0_i32_0 = arith.constant 0 : i32
    return %arg0, %c0_i32 : i32, i32
  }
  func.func @transform_2(%arg0: i32, %arg1: i32) -> (i32, i32) {
    %c0_i32 = arith.constant 0 : i32
    return %arg0, %arg1 : i32, i32
  }
  func.func @transform_3(%arg0: i32, %arg1: i32) -> (i32, i32) {
    %c0_i32 = arith.constant 0 : i32
    return %arg0, %arg1 : i32, i32
  }
  func.func @transform_4(%arg0: i32, %arg1: i32) -> (i32, i32) {
    %c0_i32 = arith.constant 0 : i32
    %c0_i32_0 = arith.constant 0 : i32
    return %arg0, %c0_i32 : i32, i32
  }
  func.func @transform_5(%arg0: i32, %arg1: i32) -> i32 {
    %c0_i32 = arith.constant 0 : i32
    %c0_i32_0 = arith.constant 0 : i32
    return %c0_i32 : i32
  }
}

</mosaic_0001>

<bundles_post_ra>
// kernel: tpu_custom_call.1
= control target key start
LH: loop header
LB: loop body
LE: loop exit
PB: predicated region body
PF: predicated region fallthrough
CT: control target
= control target key end

     0   :  { %vm81_vm0 = vcmask 31744   ;;  %s296_s0 = inlined_call_operand.vmem [shape: f32[8,4], index: 0, kind: input, shape index: {}]   ;;  %s297_s1 = inlined_call_operand.vmem [shape: s32[8,1], index: 1, kind: input, shape index: {}]   ;;  %s298_s2 = inlined_call_operand.vmem [shape: f32[8,128], index: 2, kind: input, shape index: {}]   ;;  %s299_s3 = inlined_call_operand.vmem [shape: f32[8,128], index: 3, kind: input, shape index: {}]   ;;  %s300_s4 = inlined_call_operand.vmem [shape: f32[8,2], index: 4, kind: input, shape index: {}]   ;;  %s301_s5 = inlined_call_operand.hbm [shape: f32[1], index: 5, kind: output, shape index: {}]  }
   0x1   :  { %v80_v0 = vld [vmem:[%s296_s0] sm:$0xff] }
   0x2   :  { %10 = vsyncpa [#allocation4], 0  ;;  %v82_v1 = vsel %vm81_vm0, %v80_v0, -inf  ;;  %v240_v2 = vmov 0   ;;  %v93_v3 = vld [vmem:[%s297_s1] sm:$0xff]  ;;  %v39_v9 = vlaneseq  ;;  %s241_s1 = smov 127  }
   0x3   :  { %213 = vset.pattern.permute.xlu0 %v240_v2  ;;  %v119_v14 = vld [vmem:[%s300_s4] sm:$0xff]  ;;  %vm105_vm2 = vcmask 7168   ;;  %v242_v47 = vmov 1024.0   ;;  %v243_v49 = vmov 8.0   ;;  %s184_s11 = sshll.u32 %s301_s5, 4  ;;  %s244_s14 = smov [#allocation3]   ;;  %s185_s11 = int_to_ptr.hbm [resolvable:$true] %s184_s11 }
   0x4   :  { %83 = vmax.xlane.f32.xlu0 %v82_v1  ;;  %v40_v10 = vand.u32 127, %v39_v9  ;;  %v50_v15 = vld [vmem:[%s298_s2] sm:$0xff] }
   0x5   :  { %v55_v16 = vsub.f32 1.0, %v50_v15  ;;  %v51_v23 = vld [vmem:[%s299_s3] sm:$0xff] }
  0x18   :  { %95 = vperm.xlu0 %213, %v93_v3  }
  0x77   :  { %v84_v4 = vpop.xlane.xlu0 %83 }
  0x78   :  { %v85_v5 = vsub.f32 %v80_v0, %v84_v4 }
  0x7a   :  { %v86_v6 = vmul.f32 1.442695, %v85_v5 }
  0x7c   :  { %214 = vpow2.f32 %v86_v6 }
  0x7d   :  { %216 = vlog2.f32 %v50_v15 }
  0x7e   :  { %218 = vlog2.f32 %v55_v16 }
  0x82   :  { %v215_v7 = vpop.eup %214 }
  0x83   :  { %v88_v8 = vsel %vm81_vm0, %v215_v7, 0.0  ;;  %v217_v17 = vpop.eup %216 }
  0x84   :  { %89 = vadd.xlane.f32.xlu1 %v88_v8  ;;  %v219_v18 = vpop.eup %218  ;;  %v53_v19 = vmul.f32 0.6931472, %v217_v17 }
  0x85   :  { %v57_v20 = vmul.f32 0.6931472, %v219_v18 }
  0x86   :  { %v54_v21 = vmax.f32 %v53_v19, -100.0 }
  0x87   :  { %v58_v22 = vmax.f32 %v57_v20, -100.0 }
  0x89   :  { %v59_v24 = vsub.f32 %v54_v21, %v58_v22 }
  0x8a   :  { %v96_v11 = vpop.permute.xlu0 %95 }
  0x8b   :  { %vm97_vm1 = vcmp.eq.s32.totalorder %v40_v10, %v96_v11  ;;  %v60_v25 = vmul.f32 %v59_v24, %v51_v23 }
  0x8c   :  { %v98_v12 = vsel %vm97_vm1, %v85_v5, 0.0 }
  0x8d   :  { %v99_v13 = vsel %vm81_vm0, %v98_v12, 0.0  ;;  %v61_v26 = vadd.f32 %v60_v25, %v58_v22 }
  0x8e   :  { %100 = vadd.xlane.f32.xlu2 %v99_v13 }
  0x8f   :  { %v62_v27 = vsub.f32 0.0, %v61_v26 }
  0x96   :  { %65 = vadd.xlane.f32.xlu2 %v62_v27 }
  0x9d   :  { %121 = vrot.lane.b32.xlu1 %v119_v14, %s241_s1 }
  0xf7   :  { %v90_v28 = vpop.xlane.xlu1 %89 }
  0xf8   :  { %220 = vlog2.f32 %v90_v28 }
  0xf9   :  { %222 = vrcp.f32 %v242_v47 }
  0xfa   :  { %224 = vrcp.f32 %v243_v49 }
  0xfe   :  { %v221_v29 = vpop.eup %220 }
  0xff   :  { %v92_v30 = vmul.f32 0.6931472, %v221_v29  ;;  %v223_v52 = vpop.eup %222 }
 0x100   :  { %v225_v53 = vpop.eup %224  ;;  %v145_v56 = vmul.f32 1024.0, %v223_v52  ;;  %vm149_vm3 = vweird.f32 %v223_v52 }
 0x101   :  { %v101_v31 = vpop.xlane.xlu2 %100  ;;  %v155_v57 = vmul.f32 8.0, %v225_v53  ;;  %vm159_vm4 = vweird.f32 %v225_v53 }
 0x102   :  { %v102_v32 = vsub.f32 %v92_v30, %v101_v31  ;;  %v146_v58 = vsub.f32 1.0, %v145_v56 }
 0x103   :  { %v156_v60 = vsub.f32 1.0, %v155_v57 }
 0x104   :  { %v106_v33 = vsel %vm105_vm2, %v102_v32, 0.0  ;;  %v147_v63 = vmul.f32 %v223_v52, %v146_v58 }
 0x105   :  { %107 = vadd.xlane.f32.xlu2 %v106_v33  ;;  %v157_v0 = vmul.f32 %v225_v53, %v156_v60 }
 0x106   :  { %v148_v3 = vadd.f32 %v223_v52, %v147_v63 }
 0x107   :  { %v158_v4 = vadd.f32 %v225_v53, %v157_v0 }
 0x108   :  { %v150_v7 = vsel %vm149_vm3, %v223_v52, %v148_v3 }
 0x109   :  { %v66_v38 = vpop.xlane.xlu2 %65  ;;  %v160_v8 = vsel %vm159_vm4, %v225_v53, %v158_v4 }
 0x10a   :  { %v67_v39 = vrot.slane %v66_v38, 4 }
 0x10c   :  { %v68_v40 = vadd.f32 %v67_v39, %v66_v38 }
 0x10e   :  { %v69_v41 = vrot.slane %v68_v40, 2 }
 0x10f   :  { %v122_v34 = vpop.permute.xlu1 %121 }
 0x110   :  { %v124_v35 = vsub.f32 %v119_v14, %v122_v34  ;;  %v70_v42 = vadd.f32 %v69_v41, %v68_v40 }
 0x112   :  { %v125_v36 = vand.u32 2147483647, %v124_v35  ;;  %v71_v43 = vrot.slane %v70_v42, 1 }
 0x114   :  { %v128_v37 = vsel %vm105_vm2, %v125_v36, 0.0  ;;  %v72_v44 = vadd.f32 %v71_v43, %v70_v42 }
 0x115   :  { %129 = vadd.xlane.f32.xlu2 %v128_v37 }
 0x116   :  { %198 = vpush %v72_v44 }
 0x147   :  { %s199_s2 = spop %198 }
 0x178   :  { %v108_v45 = vpop.xlane.xlu2 %107 }
 0x179   :  { %v109_v46 = vrot.slane %v108_v45, 4 }
 0x17b   :  { %v110_v48 = vadd.f32 %v109_v46, %v108_v45 }
 0x17d   :  { %v111_v50 = vrot.slane %v110_v48, 2 }
 0x17f   :  { %v112_v51 = vadd.f32 %v111_v50, %v110_v48 }
 0x181   :  { %v113_v54 = vrot.slane %v112_v51, 1 }
 0x183   :  { %v114_v55 = vadd.f32 %v113_v54, %v112_v51 }
 0x185   :  { %200 = vpush %v114_v55 }
 0x188   :  { %v130_v59 = vpop.xlane.xlu2 %129 }
 0x189   :  { %v131_v61 = vrot.slane %v130_v59, 4 }
 0x18b   :  { %v132_v62 = vadd.f32 %v131_v61, %v130_v59 }
 0x18d   :  { %v133_v1 = vrot.slane %v132_v62, 2 }
 0x18f   :  { %v134_v2 = vadd.f32 %v133_v1, %v132_v62 }
 0x191   :  { %v135_v5 = vrot.slane %v134_v2, 1 }
 0x193   :  { %v136_v6 = vadd.f32 %v135_v5, %v134_v2 }
 0x195   :  { %202 = vpush %v136_v6 }
 0x196   :  { %204 = vpush %v150_v7 }
 0x197   :  { %206 = vpush %v160_v8 }
 0x1b6   :  { %s201_s3 = spop %200 }
 0x1c6   :  { %s203_s4 = spop %202 }
 0x1c7   :  { %s205_s27 = spop %204 }
 0x1c8   :  { %s152_s28 = smul.f32 %s205_s27, %s199_s2  ;;  %s207_s29 = spop %206 }
 0x1c9   :  { %s162_s30 = smul.f32 %s207_s29, %s201_s3 }
 0x1ca   :  { %s173_s6 = smul.f32 0.5, %s152_s28 }
 0x1cb   :  { %s172_s7 = smul.f32 %s207_s29, %s203_s4 }
 0x1cc   :  { %s174_s8 = sadd.f32 %s173_s6, %s162_s30 }
 0x1cd   :  { %s175_s12 = smul.f32 0.1, %s172_s7 }
 0x1cf   :  { %s176_s13 = sadd.f32 %s175_s12, %s174_s8 }
 0x1d1   :  { %178 = sst [smem:[#allocation3]] %s176_s13 }
 0x1d2   :  { %187 = dma.smem_to_hbm %s244_s14, 16, %s185_s11, [#allocation4]  }
 0x1d3   :  { %238 = dma.done.wait [#allocation4], 16  }
 0x1d4   :  { %239 = vsyncadd [#allocation4], 4294967280 }
 0x1d5   :  { %192 = sfence }
 0x1d6   :  { %193 = vsyncpa [#allocation4], 1 }

</bundles_post_ra>
